<compile_context>
chip_gen: v5e
topology: v5e:2x2
jax: 0.10.0
libtpu: 0.0.40
codegen_flags: <defaults>
</compile_context>

<pallas_src>
import functools

import jax
import jax.numpy as jnp
from jax.experimental import pallas as pl
from jax.experimental.pallas import tpu as pltpu

EPSILON_DC = 1e-6

_LANE = 128
_SUBLANE = 8
_TF_MIN = 512
_TF_MAX = 65536      # lane extent cap; keeps a step big enough to amortize
                     # the ~0.35us per-grid-step overhead on v6e/v7x.


def _dice_partial_kernel(x_ref, t_ref, inter_ref, sum_ref, *, tail):
    """Accumulate per-row sum(x*t) and sum(x+t) over the feature grid axis."""
    k = pl.program_id(1)
    nk = pl.num_programs(1)

    @pl.when(k == 0)
    def _init():
        inter_ref[...] = jnp.zeros_like(inter_ref)
        sum_ref[...] = jnp.zeros_like(sum_ref)

    # Widen narrow dtypes in VMEM; HBM traffic stays in the native dtype.
    x = x_ref[...].astype(jnp.float32)
    t = t_ref[...].astype(jnp.float32)

    def _accumulate(xv, tv):
        inter_ref[...] += jnp.sum(xv * tv, axis=-1, keepdims=True)
        sum_ref[...] += jnp.sum(xv + tv, axis=-1, keepdims=True)  # fused x+t sum

    if tail == 0:
        _accumulate(x, t)
    else:
        # Only the last feature step is ragged; keep the hot path unmasked.
        @pl.when(k < nk - 1)
        def _full():
            _accumulate(x, t)

        @pl.when(k == nk - 1)
        def _ragged():
            # Out-of-bounds tile contents are undefined on TPU -> mask them.
            mask = jax.lax.broadcasted_iota(jnp.int32, x.shape, 1) < tail
            _accumulate(jnp.where(mask, x, 0.0), jnp.where(mask, t, 0.0))


@functools.lru_cache(maxsize=None)
def _vmem_limits():
    """(explicit scoped-VMEM limit, tile-chooser budget) in bytes."""
    try:
        phys = int(pltpu.get_tpu_info().vmem_capacity_bytes)
    except Exception:  # pragma: no cover - conservative fallback (v7x-sized)
        phys = 64 << 20
    limit = min((3 * phys) // 4, 96 << 20)   # 48 MiB on v7x, 96 MiB on v5e/v6e
    budget = (4 * limit) // 5
    return limit, budget


def _choose_split(b, f):
    """Sub-row split S so small batches fill sublanes and give >=2 batch blocks."""
    if b >= 2 * _SUBLANE:
        return 1
    s = 1
    while b * s < 2 * _SUBLANE:
        s *= 2
    # S must divide F (the reshape is a free contiguous view) and keep each
    # sub-row at least one lane-vector long.
    while s > 1 and (f % s != 0 or (f // s) < _LANE):
        s //= 2
    return s


def _choose_feature_tile(f, tb, itemsize, budget):
    """Largest lane-aligned feature tile that fits the VMEM budget."""
    tb_pad = pl.cdiv(tb, _SUBLANE) * _SUBLANE      # (8,128)-tiled VMEM layout
    # Per feature-column bytes: 2 inputs x 2 pipeline buffers in native dtype
    # plus ~4 f32-widened temporaries the compiler materializes in VMEM.
    bytes_per_col = tb_pad * (2 * 2 * itemsize + 4 * 4)
    cap = budget // bytes_per_col
    cap = max(_TF_MIN, (cap // _LANE) * _LANE)
    cap = min(cap, _TF_MAX)
    if f <= cap:
        return f          # single feature step; block dim == full array dim
    return cap            # lane-aligned tile; ragged tail masked in-kernel


@jax.jit
def dice_coef(inp, target):
    """Pallas equivalent of DiceCoef.forward. inp/target: (B, C, H, W)."""
    b = inp.shape[0]
    f = 1
    for d in inp.shape[1:]:
        f *= int(d)

    s = _choose_split(b, f)
    rows, fr = b * s, f // s
    x = inp.reshape(rows, fr)       # contiguous reshape: free view, no copy
    t = target.reshape(rows, fr)

    itemsize = max(jnp.dtype(x.dtype).itemsize, jnp.dtype(t.dtype).itemsize)
    vmem_limit, budget = _vmem_limits()

    tb = _SUBLANE if rows >= _SUBLANE else rows
    tf = _choose_feature_tile(fr, tb, itemsize, budget)
    tail = fr % tf

    grid = (pl.cdiv(rows, tb), pl.cdiv(fr, tf))

    inter, sums = pl.pallas_call(
        functools.partial(_dice_partial_kernel, tail=tail),
        out_shape=(jax.ShapeDtypeStruct((rows, 1), jnp.float32),
                   jax.ShapeDtypeStruct((rows, 1), jnp.float32)),
        grid_spec=pltpu.PrefetchScalarGridSpec(
            num_scalar_prefetch=0,
            grid=grid,
            in_specs=[
                pl.BlockSpec((tb, tf), lambda i, k: (i, k)),
                pl.BlockSpec((tb, tf), lambda i, k: (i, k)),
            ],
            out_specs=[
                pl.BlockSpec((tb, 1), lambda i, k: (i, 0)),
                pl.BlockSpec((tb, 1), lambda i, k: (i, 0)),
            ],
        ),
        compiler_params=pltpu.CompilerParams(
            dimension_semantics=("parallel", "arbitrary"),
            vmem_limit_bytes=vmem_limit),
    )(x, t)

    # Tiny combine in the wrapper: fold the S sub-rows back into each sample,
    # then the Dice division and batch mean over B scalars.
    if s > 1:
        inter = inter.reshape(b, s).sum(axis=1)
        sums = sums.reshape(b, s).sum(axis=1)
    else:
        inter = inter[:, 0]
        sums = sums[:, 0]
    dice = (2.0 * inter + EPSILON_DC) / (sums + EPSILON_DC)
    return jnp.mean(dice)


def dice_coef_ref(inp, target):
    """Pure-JAX reference mirroring the PyTorch forward."""
    b = inp.shape[0]
    x = inp.reshape(b, -1).astype(jnp.float32)
    t = target.reshape(b, -1).astype(jnp.float32)
    inter = jnp.sum(x * t, axis=-1)
    dice = (2.0 * inter + EPSILON_DC) / (jnp.sum(x, -1) + jnp.sum(t, -1) + EPSILON_DC)
    return jnp.mean(dice)


if __name__ == "__main__":
    key = jax.random.PRNGKey(0)
    k1, k2 = jax.random.split(key)
    B, C, H, W = 2, 4, 16, 16
    # Segmentation-style inputs: probabilities and a binary mask.
    inp = jax.nn.sigmoid(jax.random.normal(k1, (B, C, H, W), dtype=jnp.float32))
    target = (jax.random.uniform(k2, (B, C, H, W)) > 0.5).astype(jnp.float32)

    out = dice_coef(inp, target)
    out = jax.block_until_ready(out)

    ref = dice_coef_ref(inp, target)
    assert jnp.allclose(out, ref, rtol=1e-5, atol=1e-6), (out, ref)
    print("KERNEL_OK")
</pallas_src>

<mosaic_0001>
module attributes {stable_mosaic.version = 11 : i64} {
  func.func @_dice_partial_kernel(%arg0: i32, %arg1: i32, %arg2: memref<8x128xf32, #tpu.memory_space<vmem>>, %arg3: memref<8x128xf32, #tpu.memory_space<vmem>>, %arg4: memref<8x1xf32, #tpu.memory_space<vmem>>, %arg5: memref<8x1xf32, #tpu.memory_space<vmem>>) attributes {dimension_semantics = [#tpu.dimension_semantics<parallel>, #tpu.dimension_semantics<arbitrary>], iteration_bounds = array<i64: 2, 1>, scalar_prefetch = 0 : i64, scratch_operands = 0 : i64, tpu.core_type = #tpu.core_type<tc>, window_params = [{transform_indices = @transform_0, window_bounds = array<i64: 8, 128>}, {transform_indices = @transform_1, window_bounds = array<i64: 8, 128>}, {transform_indices = @transform_2, window_bounds = array<i64: 8, 1>}, {transform_indices = @transform_3, window_bounds = array<i64: 8, 1>}]} {
    %c0_i32 = arith.constant 0 : i32
    %0 = arith.cmpi eq, %arg1, %c0_i32 : i32
    %1 = arith.extui %0 : i1 to i32
    %c0_i32_0 = arith.constant 0 : i32
    %2 = arith.cmpi ne, %1, %c0_i32_0 : i32
    scf.if %2 {
      %cst_13 = arith.constant 0.000000e+00 : f32
      %17 = vector.broadcast %cst_13 : f32 to vector<8x1xf32>
      %c0_14 = arith.constant 0 : index
      %c0_15 = arith.constant 0 : index
      %18 = vector.load %arg4[%c0_14, %c0_15] : memref<8x1xf32, #tpu.memory_space<vmem>>, vector<8x1xf32>
      tpu.vector_store %arg4[%c0_14, %c0_15], %17 {strides = array<i32>} : memref<8x1xf32, #tpu.memory_space<vmem>>, vector<8x1xf32>,
      %cst_16 = arith.constant 0.000000e+00 : f32
      %19 = vector.broadcast %cst_16 : f32 to vector<8x1xf32>
      %c0_17 = arith.constant 0 : index
      %c0_18 = arith.constant 0 : index
      %20 = vector.load %arg5[%c0_17, %c0_18] : memref<8x1xf32, #tpu.memory_space<vmem>>, vector<8x1xf32>
      tpu.vector_store %arg5[%c0_17, %c0_18], %19 {strides = array<i32>} : memref<8x1xf32, #tpu.memory_space<vmem>>, vector<8x1xf32>,
    } else {
    }
    %c0 = arith.constant 0 : index
    %c0_1 = arith.constant 0 : index
    %3 = vector.load %arg2[%c0, %c0_1] : memref<8x128xf32, #tpu.memory_space<vmem>>, vector<8x128xf32>
    %c0_2 = arith.constant 0 : index
    %c0_3 = arith.constant 0 : index
    %4 = vector.load %arg3[%c0_2, %c0_3] : memref<8x128xf32, #tpu.memory_space<vmem>>, vector<8x128xf32>
    %c0_4 = arith.constant 0 : index
    %c0_5 = arith.constant 0 : index
    %5 = vector.load %arg4[%c0_4, %c0_5] : memref<8x1xf32, #tpu.memory_space<vmem>>, vector<8x1xf32>
    %6 = arith.mulf %3, %4 : vector<8x128xf32>
    %cst = arith.constant dense<0.000000e+00> : vector<8xf32>
    %7 = vector.multi_reduction <add>, %6, %cst [1] : vector<8x128xf32> to vector<8xf32>
    %8 = vector.shape_cast %7 : vector<8xf32> to vector<8x1xf32>
    %9 = arith.addf %5, %8 : vector<8x1xf32>
    %c0_6 = arith.constant 0 : index
    %c0_7 = arith.constant 0 : index
    %10 = vector.load %arg4[%c0_6, %c0_7] : memref<8x1xf32, #tpu.memory_space<vmem>>, vector<8x1xf32>
    tpu.vector_store %arg4[%c0_6, %c0_7], %9 {strides = array<i32>} : memref<8x1xf32, #tpu.memory_space<vmem>>, vector<8x1xf32>,
    %c0_8 = arith.constant 0 : index
    %c0_9 = arith.constant 0 : index
    %11 = vector.load %arg5[%c0_8, %c0_9] : memref<8x1xf32, #tpu.memory_space<vmem>>, vector<8x1xf32>
    %12 = arith.addf %3, %4 : vector<8x128xf32>
    %cst_10 = arith.constant dense<0.000000e+00> : vector<8xf32>
    %13 = vector.multi_reduction <add>, %12, %cst_10 [1] : vector<8x128xf32> to vector<8xf32>
    %14 = vector.shape_cast %13 : vector<8xf32> to vector<8x1xf32>
    %15 = arith.addf %11, %14 : vector<8x1xf32>
    %c0_11 = arith.constant 0 : index
    %c0_12 = arith.constant 0 : index
    %16 = vector.load %arg5[%c0_11, %c0_12] : memref<8x1xf32, #tpu.memory_space<vmem>>, vector<8x1xf32>
    tpu.vector_store %arg5[%c0_11, %c0_12], %15 {strides = array<i32>} : memref<8x1xf32, #tpu.memory_space<vmem>>, vector<8x1xf32>,
    return
  }
  func.func @transform_0(%arg0: i32, %arg1: i32) -> (i32, i32) {
    %c0_i32 = arith.constant 0 : i32
    return %arg0, %arg1 : i32, i32
  }
  func.func @transform_1(%arg0: i32, %arg1: i32) -> (i32, i32) {
    %c0_i32 = arith.constant 0 : i32
    return %arg0, %arg1 : i32, i32
  }
  func.func @transform_2(%arg0: i32, %arg1: i32) -> (i32, i32) {
    %c0_i32 = arith.constant 0 : i32
    %c0_i32_0 = arith.constant 0 : i32
    return %arg0, %c0_i32 : i32, i32
  }
  func.func @transform_3(%arg0: i32, %arg1: i32) -> (i32, i32) {
    %c0_i32 = arith.constant 0 : i32
    %c0_i32_0 = arith.constant 0 : i32
    return %arg0, %c0_i32 : i32, i32
  }
}

</mosaic_0001>

<bundles_post_ra>
// kernel: dice_coef.1
= control target key start
LH: loop header
LB: loop body
LE: loop exit
PB: predicated region body
PF: predicated region fallthrough
CT: control target
= control target key end

     0   :  { %s441_s12 = smov 0   ;;  %s443_s13 = smov 0   ;;  %s484_s0 = inlined_call_operand.vmem [shape: f32[16,128], index: 0, kind: input, shape index: {}]   ;;  %s485_s1 = inlined_call_operand.vmem [shape: f32[16,128], index: 1, kind: input, shape index: {}]   ;;  %s486_s2 = inlined_call_operand.vmem [shape: f32[16,1], index: 2, kind: output, shape index: {0}]   ;;  %s487_s3 = inlined_call_operand.vmem [shape: f32[16,1], index: 3, kind: output, shape index: {1}]  }
   0x1   :  { %s445_s14 = smov 0  }
   0x2 LB: > { %s26_s15 = sadd.s32 1, %s414_s13  ;;  %p364_p0 = scmp.ge.s32.totalorder %s418_s14, 1  ;;  %s418_s14 = sphi %s445_s14, %s14_s14   ;;  %s414_s13 = sphi %s443_s13, %s489_s13   ;;  %s410_s12 = sphi %s441_s12, %s488_s12  }
   0x3   : > { %p28_p1 = scmp.ge.s32.totalorder %s26_s15, 2  ;;  %p170_p2 = scmp.lt.s32.totalorder %s418_s14, 3 }
   0x5   : > { %s491_s15 = smov (%p28_p1, %s26_s15), 0  ;;  %p171_p3 = pnand %p364_p0, %p170_p2 }
   0x6   : > { %p206_p4 = scmp.lt.s32.totalorder (!%p171_p3), %s410_s12, 1 }
   0x7   : > { %174 = sbr.rel (%p171_p3) target bundleno = 146 (0x92), region = 28 }
   0xc   : > { %s493_s12 = smov (!%p206_p4, %s410_s12), 1  ;;  %vm232_vm0 = vcmask 7168   ;;  %v420_v3 = vmov 0.0  }
   0xd   : > { %s365_s16 = sshll.u32 %s493_s12, 3 }
   0xe   : > { %s212_s19 = scalar_lea.vmem %s484_s0, %s365_s16  ;;  %s219_s22 = scalar_lea.vmem %s485_s1, %s365_s16 }
   0xf   : > { %v235_v0 = vld [vmem:[%s212_s19] sm:$0xff]  ;;  %s223_s25 = scalar_lea.vmem %s486_s2, %s365_s16  ;;  %s227_s28 = scalar_lea.vmem %s487_s3, %s365_s16 }
  0x10   : > { %v236_v1 = vld [vmem:[%s219_s22] sm:$0xff]  ;;  %233 = vst.msk [vmem:[%s223_s25] sm:$0xff] %vm232_vm0, %v420_v3 }
  0x11   : > { %v238_v2 = vmul.f32 %v236_v1, %v235_v0  ;;  %234 = vst.msk [vmem:[%s227_s28] sm:$0xff] %vm232_vm0, %v420_v3  ;;  %v245_v4 = vadd.f32 %v236_v1, %v235_v0 }
  0x13   : > { %239 = vadd.xlane.f32.xlu0 %v238_v2 }
  0x17   : > { %v237_v5 = vld [vmem:[%s223_s25] sm:$0xff] }
  0x18   : > { %v244_v8 = vld [vmem:[%s227_s28] sm:$0xff] }
  0x1b   : > { %246 = vadd.xlane.f32.xlu0 %v245_v4 }
  0x86   : > { %v240_v6 = vpop.xlane.xlu0 %239 }
  0x87   : > { %v241_v7 = vadd.f32 %v240_v6, %v237_v5 }
  0x89   : > { %243 = vst.msk [vmem:[%s223_s25] sm:$0xff] %vm232_vm0, %v241_v7 }
  0x8e   : > { %v247_v9 = vpop.xlane.xlu0 %246 }
  0x8f   : > { %v248_v10 = vadd.f32 %v247_v9, %v244_v8 }
  0x91   : > { %249 = vst.msk [vmem:[%s227_s28] sm:$0xff] %vm232_vm0, %v248_v10 }
  0x92 PF: > { %s14_s14 = sadd.s32 1, %s418_s14   ;;  %s488_s12 = smov %s414_s13 }
  0x93   : > { %p11_p5 = scmp.ge.s32.totalorder %s14_s14, 4   ;;  %s489_s13 = smov %s491_s15 }
  0x95   :  { %13 = sbr.rel (!%p11_p5) target bundleno = 2 (0x2), region = 77 }

</bundles_post_ra>
